<compile_context>
chip_gen: v6e
topology: v6e:2x2x1
jax: 0.10.0
libtpu: 0.0.40
codegen_flags: <defaults>
</compile_context>

<pallas_src>
import functools

import jax
import jax.numpy as jnp
from jax.experimental import pallas as pl
from jax.experimental.pallas import tpu as pltpu


def _round_up(x: int, m: int) -> int:
    return ((x + m - 1) // m) * m


def _make_mlp_kernel(num_layers: int, matmul_dtype, negative_slope: float = 0.2):
    """Fused-MLP kernel body: x_ref, w0..w{L-1}, bias_stack, out_ref."""

    def kernel(*refs):
        x_ref = refs[0]
        o_ref = refs[-1]
        b_ref = refs[-2]            # (num_layers, max_Npad) f32, lane-padded
        w_refs = refs[1:-2]         # one (Kpad, Npad) weight per layer

        h = x_ref[...].astype(jnp.float32)      # keep f32 on the VPU path
        for l in range(num_layers):
            w = w_refs[l][...]
            npad = w.shape[1]
            b = b_ref[l:l + 1, 0:npad]          # (1, Npad) static slice
            y = jnp.dot(h.astype(matmul_dtype), w,
                        preferred_element_type=jnp.float32) + b
            if l < num_layers - 1:              # LeakyReLU(0.2) on hidden layers
                y = jnp.where(y > 0, y, negative_slope * y)
            h = y
        o_ref[...] = h.astype(o_ref.dtype)

    return kernel


@functools.partial(jax.jit, static_argnames=("matmul_dtype",))
def mlp_forward(x, params, *, matmul_dtype=jnp.float32):
    """Fused MLP forward pass.

    x:      (batch, in_features) float32
    params: tuple of (W, b) pairs, W: (d_in, d_out) == torch weight.T,
            b: (1, d_out) or (d_out,)
    matmul_dtype: dtype used for the MXU operands (jnp.float32 or jnp.bfloat16).
    """
    B, d_in = x.shape
    L = len(params)
    out_dim = params[-1][0].shape[1]

    # ---- lane-pad every feature dim to a multiple of 128 --------------------
    dims = [d_in] + [w.shape[1] for (w, _) in params]
    pdims = [_round_up(d, 128) for d in dims]
    maxn = max(pdims[1:])

    # ---- batch tiling: one big block (<=256 rows), grid=(1,) for small B ----
    Bp = _round_up(B, 8)
    block_b = min(Bp, 256)
    Bp = _round_up(Bp, block_b)
    grid = (Bp // block_b,)

    x_p = jnp.pad(x.astype(jnp.float32), ((0, Bp - B), (0, pdims[0] - d_in)))

    # Zero-pad weights (zero rows/cols keep padded outputs exactly zero) and
    # pack all biases into a single lane-padded (L, maxn) array (one DMA).
    w_ps = []
    b_stack = jnp.zeros((L, maxn), jnp.float32)
    for l, (w, b) in enumerate(params):
        k, n = w.shape
        w_p = jnp.pad(w, ((0, pdims[l] - k), (0, pdims[l + 1] - n)))
        w_ps.append(w_p.astype(matmul_dtype))
        b_stack = b_stack.at[l, :n].set(b.reshape(-1).astype(jnp.float32))

    in_specs = [pl.BlockSpec((block_b, pdims[0]), lambda i: (i, 0))]
    in_specs += [pl.BlockSpec(w_p.shape, lambda i: (0, 0)) for w_p in w_ps]
    in_specs += [pl.BlockSpec(b_stack.shape, lambda i: (0, 0))]

    out_specs = pl.BlockSpec((block_b, pdims[-1]), lambda i: (i, 0))

    kernel = _make_mlp_kernel(L, matmul_dtype, negative_slope=0.2)

    out_padded = pl.pallas_call(
        kernel,
        out_shape=jax.ShapeDtypeStruct((Bp, pdims[-1]), jnp.float32),
        grid_spec=pl.GridSpec(grid=grid, in_specs=in_specs, out_specs=out_specs),
        compiler_params=pltpu.CompilerParams(
            dimension_semantics=(("arbitrary",) if grid[0] == 1
                                 else ("parallel",))),
    )(x_p, *w_ps, b_stack)

    # lane-dense kernel output; slice back to the true (B, out_dim)
    return out_padded[:B, :out_dim]


def init_params(key, inputs, hiddens, outputs):
    """Deterministic synthetic parameters matching nn.Linear shapes.

    PyTorch stores weight as (out, in); we store its transpose (in, out)."""
    dims = [inputs] + list(hiddens) + [outputs]
    params = []
    for d_in, d_out in zip(dims[:-1], dims[1:]):
        key, kw, kb = jax.random.split(key, 3)
        bound = 1.0 / jnp.sqrt(d_in)
        w = jax.random.uniform(kw, (d_in, d_out), jnp.float32, -bound, bound)
        b = jax.random.uniform(kb, (1, d_out), jnp.float32, -bound, bound)
        params.append((w, b))
    return tuple(params)


def mlp_reference(x, params, negative_slope=0.2):
    h = x
    n = len(params)
    for l, (w, b) in enumerate(params):
        h = h @ w + b.reshape(1, -1)
        if l < n - 1:
            h = jnp.where(h > 0, h, negative_slope * h)
    return h


if __name__ == "__main__":
    # Shapes consistent with the module: inputs=32, hiddens=[64, 48], outputs=4
    batch, inputs, hiddens, outputs = 16, 32, [64, 48], 4

    key = jax.random.PRNGKey(0)
    key, kx = jax.random.split(key)
    x = jax.random.normal(kx, (batch, inputs), jnp.float32)
    params = init_params(key, inputs, hiddens, outputs)

    ref = mlp_reference(x, params)

    # f32 MXU path (exact vs reference)
    out = jax.block_until_ready(mlp_forward(x, params))
    assert out.shape == (batch, outputs)
    assert jnp.allclose(out, ref, atol=1e-4, rtol=1e-4), "Pallas f32 output mismatch"

    # bf16 MXU-operand path (v6e/v7x fast path; f32 accumulation, f32 activations)
    out_bf16 = jax.block_until_ready(
        mlp_forward(x, params, matmul_dtype=jnp.bfloat16))
    assert out_bf16.shape == (batch, outputs)
    assert jnp.allclose(out_bf16, ref, atol=1e-1, rtol=5e-2), \
        "Pallas bf16-matmul output mismatch"

    print("KERNEL_OK")
</pallas_src>

<mosaic_0001>
module attributes {stable_mosaic.version = 11 : i64} {
  func.func @kernel(%arg0: i32, %arg1: memref<16x128xf32, #tpu.memory_space<vmem>>, %arg2: memref<128x128xf32, #tpu.memory_space<vmem>>, %arg3: memref<128x128xf32, #tpu.memory_space<vmem>>, %arg4: memref<128x128xf32, #tpu.memory_space<vmem>>, %arg5: memref<3x128xf32, #tpu.memory_space<vmem>>, %arg6: memref<16x128xf32, #tpu.memory_space<vmem>>) attributes {dimension_semantics = [#tpu.dimension_semantics<arbitrary>], iteration_bounds = array<i64: 1>, scalar_prefetch = 0 : i64, scratch_operands = 0 : i64, tpu.core_type = #tpu.core_type<tc>, window_params = [{transform_indices = @transform_0, window_bounds = array<i64: 16, 128>}, {pipeline_mode = #tpu.pipeline_mode<synchronous>, transform_indices = @transform_1, window_bounds = array<i64: 128, 128>}, {pipeline_mode = #tpu.pipeline_mode<synchronous>, transform_indices = @transform_2, window_bounds = array<i64: 128, 128>}, {pipeline_mode = #tpu.pipeline_mode<synchronous>, transform_indices = @transform_3, window_bounds = array<i64: 128, 128>}, {pipeline_mode = #tpu.pipeline_mode<synchronous>, transform_indices = @transform_4, window_bounds = array<i64: 3, 128>}, {transform_indices = @transform_5, window_bounds = array<i64: 16, 128>}]} {
    %c0 = arith.constant 0 : index
    %c0_0 = arith.constant 0 : index
    %0 = vector.load %arg1[%c0, %c0_0] : memref<16x128xf32, #tpu.memory_space<vmem>>, vector<16x128xf32>
    %c0_1 = arith.constant 0 : index
    %c0_2 = arith.constant 0 : index
    %1 = vector.load %arg2[%c0_1, %c0_2] : memref<128x128xf32, #tpu.memory_space<vmem>>, vector<128x128xf32>
    %c0_3 = arith.constant 0 : index
    %c0_4 = arith.constant 0 : index
    %2 = vector.load %arg5[%c0_3, %c0_4] : memref<3x128xf32, #tpu.memory_space<vmem>>, vector<1x128xf32>
    %cst = arith.constant dense<0.000000e+00> : vector<16x128xf32>
    %3 = tpu.matmul %0, %1, %cst {dimension_numbers = #tpu.dot_dimension_numbers<[1], [0], [0], [1], [0, 0, 1, 1], [], []>} : vector<16x128xf32>, vector<128x128xf32>, vector<16x128xf32> -> vector<16x128xf32>
    %4 = vector.broadcast %2 : vector<1x128xf32> to vector<16x128xf32>
    %5 = arith.addf %3, %4 : vector<16x128xf32>
    %cst_5 = arith.constant 0.000000e+00 : f32
    %6 = vector.broadcast %cst_5 : f32 to vector<16x128xf32>
    %7 = arith.cmpf ogt, %5, %6 : vector<16x128xf32>
    %cst_6 = arith.constant 2.000000e-01 : f32
    %8 = vector.broadcast %cst_6 : f32 to vector<16x128xf32>
    %9 = arith.mulf %8, %5 : vector<16x128xf32>
    %10 = arith.select %7, %5, %9 : vector<16x128xi1>, vector<16x128xf32>
    %c0_7 = arith.constant 0 : index
    %c0_8 = arith.constant 0 : index
    %11 = vector.load %arg3[%c0_7, %c0_8] : memref<128x128xf32, #tpu.memory_space<vmem>>, vector<128x128xf32>
    %c1 = arith.constant 1 : index
    %c0_9 = arith.constant 0 : index
    %12 = vector.load %arg5[%c1, %c0_9] : memref<3x128xf32, #tpu.memory_space<vmem>>, vector<1x128xf32>
    %cst_10 = arith.constant dense<0.000000e+00> : vector<16x128xf32>
    %13 = tpu.matmul %10, %11, %cst_10 {dimension_numbers = #tpu.dot_dimension_numbers<[1], [0], [0], [1], [0, 0, 1, 1], [], []>} : vector<16x128xf32>, vector<128x128xf32>, vector<16x128xf32> -> vector<16x128xf32>
    %14 = vector.broadcast %12 : vector<1x128xf32> to vector<16x128xf32>
    %15 = arith.addf %13, %14 : vector<16x128xf32>
    %cst_11 = arith.constant 0.000000e+00 : f32
    %16 = vector.broadcast %cst_11 : f32 to vector<16x128xf32>
    %17 = arith.cmpf ogt, %15, %16 : vector<16x128xf32>
    %cst_12 = arith.constant 2.000000e-01 : f32
    %18 = vector.broadcast %cst_12 : f32 to vector<16x128xf32>
    %19 = arith.mulf %18, %15 : vector<16x128xf32>
    %20 = arith.select %17, %15, %19 : vector<16x128xi1>, vector<16x128xf32>
    %c0_13 = arith.constant 0 : index
    %c0_14 = arith.constant 0 : index
    %21 = vector.load %arg4[%c0_13, %c0_14] : memref<128x128xf32, #tpu.memory_space<vmem>>, vector<128x128xf32>
    %c2 = arith.constant 2 : index
    %c0_15 = arith.constant 0 : index
    %22 = vector.load %arg5[%c2, %c0_15] : memref<3x128xf32, #tpu.memory_space<vmem>>, vector<1x128xf32>
    %cst_16 = arith.constant dense<0.000000e+00> : vector<16x128xf32>
    %23 = tpu.matmul %20, %21, %cst_16 {dimension_numbers = #tpu.dot_dimension_numbers<[1], [0], [0], [1], [0, 0, 1, 1], [], []>} : vector<16x128xf32>, vector<128x128xf32>, vector<16x128xf32> -> vector<16x128xf32>
    %24 = vector.broadcast %22 : vector<1x128xf32> to vector<16x128xf32>
    %25 = arith.addf %23, %24 : vector<16x128xf32>
    %c0_17 = arith.constant 0 : index
    %c0_18 = arith.constant 0 : index
    %26 = vector.load %arg6[%c0_17, %c0_18] : memref<16x128xf32, #tpu.memory_space<vmem>>, vector<16x128xf32>
    tpu.vector_store %arg6[%c0_17, %c0_18], %25 {strides = array<i32>} : memref<16x128xf32, #tpu.memory_space<vmem>>, vector<16x128xf32>,
    return
  }
  func.func @transform_0(%arg0: i32) -> (i32, i32) {
    %c0_i32 = arith.constant 0 : i32
    %c0_i32_0 = arith.constant 0 : i32
    return %arg0, %c0_i32 : i32, i32
  }
  func.func @transform_1(%arg0: i32) -> (i32, i32) {
    %c0_i32 = arith.constant 0 : i32
    %c0_i32_0 = arith.constant 0 : i32
    %c0_i32_1 = arith.constant 0 : i32
    return %c0_i32, %c0_i32_0 : i32, i32
  }
  func.func @transform_2(%arg0: i32) -> (i32, i32) {
    %c0_i32 = arith.constant 0 : i32
    %c0_i32_0 = arith.constant 0 : i32
    %c0_i32_1 = arith.constant 0 : i32
    return %c0_i32, %c0_i32_0 : i32, i32
  }
  func.func @transform_3(%arg0: i32) -> (i32, i32) {
    %c0_i32 = arith.constant 0 : i32
    %c0_i32_0 = arith.constant 0 : i32
    %c0_i32_1 = arith.constant 0 : i32
    return %c0_i32, %c0_i32_0 : i32, i32
  }
  func.func @transform_4(%arg0: i32) -> (i32, i32) {
    %c0_i32 = arith.constant 0 : i32
    %c0_i32_0 = arith.constant 0 : i32
    %c0_i32_1 = arith.constant 0 : i32
    return %c0_i32, %c0_i32_0 : i32, i32
  }
  func.func @transform_5(%arg0: i32) -> (i32, i32) {
    %c0_i32 = arith.constant 0 : i32
    %c0_i32_0 = arith.constant 0 : i32
    return %arg0, %c0_i32 : i32, i32
  }
}

</mosaic_0001>

<bundles_post_ra>
// kernel: mlp_forward.1
= control target key start
LH: loop header
LB: loop body
LE: loop exit
PB: predicated region body
PF: predicated region fallthrough
CT: control target
= control target key end

     0   :  { %s685_s1 = inlined_call_operand.vmem [shape: f32[128,128], index: 1, kind: input, shape index: {}]   ;;  %s686_s0 = inlined_call_operand.vmem [shape: f32[16,128], index: 0, kind: input, shape index: {}]   ;;  %s687_s2 = inlined_call_operand.vmem [shape: f32[128,128], index: 2, kind: input, shape index: {}]   ;;  %s688_s3 = inlined_call_operand.vmem [shape: f32[128,128], index: 3, kind: input, shape index: {}]   ;;  %s689_s4 = inlined_call_operand.vmem [shape: f32[3,128], index: 4, kind: input, shape index: {}]   ;;  %s690_s5 = inlined_call_operand.vmem [shape: f32[16,128], index: 5, kind: output, shape index: {}]  }
   0x1   :  { %v37_v0 = vld [vmem:[%s685_s1 + $0x78] sm:$0xff]  ;;  %v36_v1 = vld [vmem:[%s685_s1 + $0x70] sm:$0xff]  ;;  %v35_v2 = vld [vmem:[%s685_s1 + $0x68] sm:$0xff] }
   0x2   :  { %385 = vmatprep.subr.mxu0 %v37_v0  ;;  %v34_v3 = vld [vmem:[%s685_s1 + $0x60] sm:$0xff]  ;;  %v33_v5 = vld [vmem:[%s685_s1 + $0x58] sm:$0xff]  ;;  %v138_v7 = vld [vmem:[%s687_s2 + $0x70] sm:$0xff] }
   0x3   :  { %386 = vmatpush3.msra.mxu0 %v37_v0  ;;  %v20_v4 = vld [vmem:[%s686_s0] sm:$0xff]  ;;  %v139_v6 = vld [vmem:[%s687_s2 + $0x78] sm:$0xff]  ;;  %v32_v8 = vld [vmem:[%s685_s1 + $0x50] sm:$0xff] }
   0x4   :  { %387 = vmatprep.subr.mxu0 %v36_v1  ;;  %417 = vmatprep.mubr.f32.mxu0 %v20_v4  ;;  %v137_v9 = vld [vmem:[%s687_s2 + $0x68] sm:$0xff]  ;;  %v136_v11 = vld [vmem:[%s687_s2 + $0x60] sm:$0xff]  ;;  %v135_v13 = vld [vmem:[%s687_s2 + $0x58] sm:$0xff] }
   0x5   :  { %388 = vmatpush3.msra.mxu0 %v36_v1  ;;  %420 = vmatprep.subr.mxu1 %v139_v6  ;;  %v31_v10 = vld [vmem:[%s685_s1 + $0x48] sm:$0xff]  ;;  %v30_v12 = vld [vmem:[%s685_s1 + $0x40] sm:$0xff]  ;;  %v29_v14 = vld [vmem:[%s685_s1 + $0x38] sm:$0xff] }
   0x6   :  { %389 = vmatprep.subr.mxu0 %v35_v2  ;;  %421 = vmatpush3.msra.mxu1 %v139_v6  ;;  %v134_v15 = vld [vmem:[%s687_s2 + $0x50] sm:$0xff]  ;;  %v133_v17 = vld [vmem:[%s687_s2 + $0x48] sm:$0xff]  ;;  %v132_v19 = vld [vmem:[%s687_s2 + $0x40] sm:$0xff] }
   0x7   :  { %390 = vmatpush3.msra.mxu0 %v35_v2  ;;  %422 = vmatprep.subr.mxu1 %v138_v7  ;;  %v28_v16 = vld [vmem:[%s685_s1 + $0x30] sm:$0xff]  ;;  %v27_v18 = vld [vmem:[%s685_s1 + $0x28] sm:$0xff]  ;;  %v26_v20 = vld [vmem:[%s685_s1 + $0x20] sm:$0xff] }
   0x8   :  { %391 = vmatprep.subr.mxu0 %v34_v3  ;;  %423 = vmatpush3.msra.mxu1 %v138_v7  ;;  %v131_v21 = vld [vmem:[%s687_s2 + $0x38] sm:$0xff]  ;;  %v130_v23 = vld [vmem:[%s687_s2 + $0x30] sm:$0xff]  ;;  %v129_v25 = vld [vmem:[%s687_s2 + $0x28] sm:$0xff] }
   0x9   :  { %392 = vmatpush3.msra.mxu0 %v34_v3  ;;  %424 = vmatprep.subr.mxu1 %v137_v9  ;;  %v25_v22 = vld [vmem:[%s685_s1 + $0x18] sm:$0xff]  ;;  %v24_v24 = vld [vmem:[%s685_s1 + $0x10] sm:$0xff]  ;;  %v23_v26 = vld [vmem:[%s685_s1 + $0x8] sm:$0xff] }
   0xa   :  { %393 = vmatprep.subr.mxu0 %v33_v5  ;;  %425 = vmatpush3.msra.mxu1 %v137_v9  ;;  %v128_v27 = vld [vmem:[%s687_s2 + $0x20] sm:$0xff]  ;;  %v21_v29 = vld [vmem:[%s686_s0 + $0x8] sm:$0xff]  ;;  %v127_v30 = vld [vmem:[%s687_s2 + $0x18] sm:$0xff] }
   0xb   :  { %394 = vmatpush3.msra.mxu0 %v33_v5  ;;  %426 = vmatprep.subr.mxu1 %v136_v11  ;;  %v22_v28 = vld [vmem:[%s685_s1] sm:$0xff]  ;;  %v126_v31 = vld [vmem:[%s687_s2 + $0x10] sm:$0xff]  ;;  %v125_v32 = vld [vmem:[%s687_s2 + $0x8] sm:$0xff] }
   0xc   :  { %395 = vmatprep.subr.mxu0 %v32_v8  ;;  %427 = vmatpush3.msra.mxu1 %v136_v11  ;;  %v124_v33 = vld [vmem:[%s687_s2] sm:$0xff]  ;;  %v241_v34 = vld [vmem:[%s688_s3 + $0x78] sm:$0xff]  ;;  %v240_v35 = vld [vmem:[%s688_s3 + $0x70] sm:$0xff] }
   0xd   :  { %396 = vmatpush3.msra.mxu0 %v32_v8  ;;  %428 = vmatprep.subr.mxu1 %v135_v13  ;;  %v239_v36 = vld [vmem:[%s688_s3 + $0x68] sm:$0xff]  ;;  %v238_v37 = vld [vmem:[%s688_s3 + $0x60] sm:$0xff]  ;;  %v237_v38 = vld [vmem:[%s688_s3 + $0x58] sm:$0xff] }
   0xe   :  { %397 = vmatprep.subr.mxu0 %v31_v10  ;;  %429 = vmatpush3.msra.mxu1 %v135_v13  ;;  %v236_v39 = vld [vmem:[%s688_s3 + $0x50] sm:$0xff]  ;;  %v235_v40 = vld [vmem:[%s688_s3 + $0x48] sm:$0xff]  ;;  %v234_v41 = vld [vmem:[%s688_s3 + $0x40] sm:$0xff] }
   0xf   :  { %398 = vmatpush3.msra.mxu0 %v31_v10  ;;  %430 = vmatprep.subr.mxu1 %v134_v15  ;;  %v233_v42 = vld [vmem:[%s688_s3 + $0x38] sm:$0xff]  ;;  %v232_v43 = vld [vmem:[%s688_s3 + $0x30] sm:$0xff]  ;;  %v231_v44 = vld [vmem:[%s688_s3 + $0x28] sm:$0xff] }
  0x10   :  { %399 = vmatprep.subr.mxu0 %v30_v12  ;;  %431 = vmatpush3.msra.mxu1 %v134_v15  ;;  %v230_v45 = vld [vmem:[%s688_s3 + $0x20] sm:$0xff]  ;;  %v229_v55 = vld [vmem:[%s688_s3 + $0x18] sm:$0xff]  ;;  %v228_v56 = vld [vmem:[%s688_s3 + $0x10] sm:$0xff] }
  0x11   :  { %400 = vmatpush3.msra.mxu0 %v30_v12  ;;  %432 = vmatprep.subr.mxu1 %v133_v17  ;;  %v328_v46 = vld [vmem:[%s689_s4] ss:$0 sm:$0xff]  ;;  %v227_v57 = vld [vmem:[%s688_s3 + $0x8] sm:$0xff]  ;;  %v329_v59 = vld [vmem:[%s689_s4 + $0x1] ss:$0 sm:$0xff] }
  0x12   :  { %401 = vmatprep.subr.mxu0 %v29_v14  ;;  %433 = vmatpush3.msra.mxu1 %v133_v17  ;;  %v226_v58 = vld [vmem:[%s688_s3] sm:$0xff] }
  0x13   :  { %402 = vmatpush3.msra.mxu0 %v29_v14  ;;  %434 = vmatprep.subr.mxu1 %v132_v19  ;;  %v330_v4 = vld [vmem:[%s689_s4 + $0x2] ss:$0 sm:$0xff] }
  0x14   :  { %403 = vmatprep.subr.mxu0 %v28_v16  ;;  %435 = vmatpush3.msra.mxu1 %v132_v19 }
  0x15   :  { %404 = vmatpush3.msra.mxu0 %v28_v16  ;;  %436 = vmatprep.subr.mxu1 %v131_v21 }
  0x16   :  { %405 = vmatprep.subr.mxu0 %v27_v18  ;;  %437 = vmatpush3.msra.mxu1 %v131_v21 }
  0x17   :  { %406 = vmatpush3.msra.mxu0 %v27_v18  ;;  %438 = vmatprep.subr.mxu1 %v130_v23 }
  0x18   :  { %407 = vmatprep.subr.mxu0 %v26_v20  ;;  %439 = vmatpush3.msra.mxu1 %v130_v23 }
  0x19   :  { %408 = vmatpush3.msra.mxu0 %v26_v20  ;;  %440 = vmatprep.subr.mxu1 %v129_v25 }
  0x1a   :  { %409 = vmatprep.subr.mxu0 %v25_v22  ;;  %441 = vmatpush3.msra.mxu1 %v129_v25 }
  0x1b   :  { %410 = vmatpush3.msra.mxu0 %v25_v22  ;;  %442 = vmatprep.subr.mxu1 %v128_v27 }
  0x1c   :  { %411 = vmatprep.subr.mxu0 %v24_v24  ;;  %443 = vmatpush3.msra.mxu1 %v128_v27 }
  0x1d   :  { %412 = vmatpush3.msra.mxu0 %v24_v24  ;;  %444 = vmatprep.subr.mxu1 %v127_v30 }
  0x1e   :  { %413 = vmatprep.subr.mxu0 %v23_v26  ;;  %445 = vmatpush3.msra.mxu1 %v127_v30 }
  0x1f   :  { %414 = vmatpush3.msra.mxu0 %v23_v26  ;;  %446 = vmatprep.subr.mxu1 %v126_v31 }
  0x20   :  { %415 = vmatprep.subr.mxu0 %v22_v28  ;;  %447 = vmatpush3.msra.mxu1 %v126_v31 }
  0x21   :  { %416 = vmatpush3.msra.mxu0 %v22_v28  ;;  %448 = vmatprep.subr.mxu1 %v125_v32 }
  0x22   :  { %418 = vmatmul.mubr.f32.vlgmr.msra.gmra.mxu0 %v21_v29  ;;  %449 = vmatpush3.msra.mxu1 %v125_v32 }
  0x23   :  { %450 = vmatprep.subr.mxu1 %v124_v33  ;;  %455 = vmatprep.subr.mxu0 %v241_v34 }
  0x24   :  { %451 = vmatpush3.msra.mxu1 %v124_v33  ;;  %456 = vmatpush3.msra.mxu0 %v241_v34 }
  0x25   :  { %457 = vmatprep.subr.mxu0 %v240_v35 }
  0x26   :  { %458 = vmatpush3.msra.mxu0 %v240_v35 }
  0x27   :  { %459 = vmatprep.subr.mxu0 %v239_v36 }
  0x28   :  { %460 = vmatpush3.msra.mxu0 %v239_v36 }
  0x29   :  { %461 = vmatprep.subr.mxu0 %v238_v37 }
  0x2a   :  { %462 = vmatpush3.msra.mxu0 %v238_v37 }
  0x2b   :  { %463 = vmatprep.subr.mxu0 %v237_v38 }
  0x2c   :  { %464 = vmatpush3.msra.mxu0 %v237_v38 }
  0x2d   :  { %465 = vmatprep.subr.mxu0 %v236_v39 }
  0x2e   :  { %466 = vmatpush3.msra.mxu0 %v236_v39 }
  0x2f   :  { %467 = vmatprep.subr.mxu0 %v235_v40 }
  0x30   :  { %468 = vmatpush3.msra.mxu0 %v235_v40 }
  0x31   :  { %469 = vmatprep.subr.mxu0 %v234_v41 }
  0x32   :  { %470 = vmatpush3.msra.mxu0 %v234_v41 }
  0x33   :  { %471 = vmatprep.subr.mxu0 %v233_v42 }
  0x34   :  { %472 = vmatpush3.msra.mxu0 %v233_v42 }
  0x35   :  { %473 = vmatprep.subr.mxu0 %v232_v43 }
  0x36   :  { %474 = vmatpush3.msra.mxu0 %v232_v43 }
  0x37   :  { %475 = vmatprep.subr.mxu0 %v231_v44 }
  0x38   :  { %476 = vmatpush3.msra.mxu0 %v231_v44 }
  0x39   :  { %477 = vmatprep.subr.mxu0 %v230_v45 }
  0x3a   :  { %478 = vmatpush3.msra.mxu0 %v230_v45 }
  0x3b   :  { %479 = vmatprep.subr.mxu0 %v229_v55 }
  0x3c   :  { %480 = vmatpush3.msra.mxu0 %v229_v55 }
  0x3d   :  { %481 = vmatprep.subr.mxu0 %v228_v56 }
  0x3e   :  { %482 = vmatpush3.msra.mxu0 %v228_v56 }
  0x3f   :  { %483 = vmatprep.subr.mxu0 %v227_v57 }
  0x40   :  { %484 = vmatpush3.msra.mxu0 %v227_v57 }
  0x41   :  { %485 = vmatprep.subr.mxu0 %v226_v58 }
  0x42   :  { %486 = vmatpush3.msra.mxu0 %v226_v58 }
  0xe2   :  { %v419_v47 = vpop.f32.mrf.mxu0 }
  0xe3   :  { %v115_v48 = vadd.f32 %v419_v47, %v328_v46 }
  0xe4   :  { %v109_v49 = vpop.f32.mrf.mxu0 }
  0xe5   :  { %v110_v50 = vadd.f32 %v328_v46, %v109_v49  ;;  %v121_v51 = vmul.f32 0.2, %v115_v48  ;;  %vm119_vm1 = vcmp.gt.f32.partialorder %v115_v48, 0.0 }
  0xe7   :  { %vm118_vm0 = vcmp.gt.f32.partialorder %v110_v50, 0.0  ;;  %v120_v52 = vmul.f32 0.2, %v110_v50  ;;  %v123_v54 = vsel %vm119_vm1, %v115_v48, %v121_v51 }
  0xe9   :  { %v122_v53 = vsel %vm118_vm0, %v110_v50, %v120_v52 }
  0xea   :  { %452 = vmatprep.mubr.f32.mxu1 %v122_v53 }
  0xeb   :  { %453 = vmatmul.mubr.f32.vlgmr.msra.gmra.mxu1 %v123_v54 }
 0x1ab   :  { %v454_v60 = vpop.f32.mrf.mxu1 }
 0x1ac   :  { %v217_v61 = vadd.f32 %v454_v60, %v329_v59 }
 0x1ad   :  { %v211_v62 = vpop.f32.mrf.mxu1 }
 0x1ae   :  { %v212_v63 = vadd.f32 %v329_v59, %v211_v62  ;;  %v223_v0 = vmul.f32 0.2, %v217_v61  ;;  %vm221_vm2 = vcmp.gt.f32.partialorder %v217_v61, 0.0 }
 0x1b0   :  { %v222_v1 = vmul.f32 0.2, %v212_v63  ;;  %vm220_vm3 = vcmp.gt.f32.partialorder %v212_v63, 0.0  ;;  %v225_v3 = vsel %vm221_vm2, %v217_v61, %v223_v0 }
 0x1b2   :  { %v224_v2 = vsel %vm220_vm3, %v212_v63, %v222_v1 }
 0x1b3   :  { %487 = vmatprep.mubr.f32.mxu0 %v224_v2 }
 0x1b4   :  { %488 = vmatmul.mubr.f32.vlgmr.msra.gmra.mxu0 %v225_v3 }
 0x274   :  { %v489_v5 = vpop.f32.mrf.mxu0 }
 0x275   :  { %v319_v6 = vadd.f32 %v489_v5, %v330_v4 }
 0x276   :  { %v313_v7 = vpop.f32.mrf.mxu0 }
 0x277   :  { %323 = vst [vmem:[%s690_s5 + $0x8] sm:$0xff] %v319_v6  ;;  %v314_v8 = vadd.f32 %v330_v4, %v313_v7 }
 0x279   :  { %322 = vst [vmem:[%s690_s5] sm:$0xff] %v314_v8 }

</bundles_post_ra>
